<compile_context>
chip_gen: v6e
topology: v6e:2x2x1
jax: 0.10.0
libtpu: 0.0.40
codegen_flags: <defaults>
</compile_context>

<pallas_src>
import jax
import jax.numpy as jnp
from jax.experimental import pallas as pl
from jax.experimental.pallas import tpu as pltpu


def attn_decoder_kernel(hidden_ref, mask_ref, w1_ref, b1_ref, w2_ref, wo_ref, bo_ref,
                        predict_ref, attn_ref):
    h = hidden_ref[...]                                   # (bB, T, H)
    bB, T, H = h.shape
    H2 = w1_ref.shape[1]

    # --- TanhAttention projection: one (bB*T, H) x (H, H/2) MXU matmul, f32 accumulate ---
    h2d = h.reshape(bB * T, H)
    a1 = jnp.tanh(
        jnp.dot(h2d, w1_ref[...], preferred_element_type=jnp.float32) + b1_ref[...]
    )                                                     # (bB*T, H2), f32
    a1 = a1.reshape(bB, T, H2)

    # --- second projection (H/2 -> 1) as VPU multiply + lane reduction:
    #     yields scores directly as a lane-dense (bB, T) tile (no N=1 MXU matmul,
    #     no lane-1 -> lane-T relayout). w2_ref is the (1, H2) row vector.
    scores = jnp.sum(a1 * w2_ref[...], axis=-1)           # (bB, T), f32

    # --- masked softmax over the sequence axis ---
    mask = mask_ref[...]                                  # (bB, T), 1.0 = padded
    neg_big = jnp.float32(-1e30)                          # stands in for -inf (no NaN on all-masked rows)
    scores = jnp.where(mask > 0.5, neg_big, scores)
    m = jnp.max(scores, axis=-1, keepdims=True)
    e = jnp.exp(scores - m)
    denom = jnp.sum(e, axis=-1, keepdims=True)
    attn = e * pl.reciprocal(denom, approx=True)          # EUP reciprocal (free slot)
    attn_ref[...] = attn

    # --- context: batched (1,T) x (T,H) contraction on the MXU
    #     (avoids materializing the (bB, T, H) broadcast product) ---
    context = jnp.einsum(
        'bqt,bth->bqh', attn.astype(h.dtype)[:, None, :], h,
        preferred_element_type=jnp.float32,
    )[:, 0, :]                                            # (bB, H), f32

    # --- output linear ---
    predict_ref[...] = (
        jnp.dot(context, wo_ref[...], preferred_element_type=jnp.float32) + bo_ref[...]
    )


def _pick_block_b(B, T, H, itemsize, max_block_b, budget_bytes=8 << 20):
    """Largest batch block that divides B, keeps the leading block dim a multiple of 8
    (or the full batch), and keeps the double-buffered hidden block under budget_bytes
    (conservative for v7x's 64 MiB VMEM and v5e's 16 MiB scoped default)."""
    best = None
    cand = 8
    while cand <= min(B, max_block_b):
        if B % cand == 0 and 2 * cand * T * H * itemsize <= budget_bytes:
            best = cand
        cand += 8
    return best if best is not None else B


def attn_decoder(hidden, masks, params, *, max_block_b=256, use_bf16=False):
    B, T, H = hidden.shape
    H2 = params["w1"].shape[1]
    out_size = params["wo"].shape[1]

    # Optional bf16 streaming of the dominant HBM tensors (hidden, w1); f32 accumulate.
    stream_dtype = jnp.bfloat16 if use_bf16 else jnp.float32
    itemsize = 2 if use_bf16 else 4
    hidden_in = hidden.astype(stream_dtype)
    w1_in = params["w1"].astype(stream_dtype)
    w2_row = params["w2"].reshape(1, H2).astype(jnp.float32)   # lane-dense row vector

    bB = _pick_block_b(B, T, H, itemsize, max_block_b)
    grid = (B // bB,)

    flops = (2 * B * T * H * H2          # first projection
             + 2 * B * T * H2            # score multiply-reduce
             + 2 * B * T * H             # context contraction
             + 2 * B * H * out_size)     # output linear
    transcendentals = B * T * H2 + B * T  # tanh + exp
    bytes_accessed = (hidden_in.size * itemsize
                      + masks.size * 4
                      + H * H2 * itemsize + (H2 + H2 + H * out_size + out_size) * 4
                      + B * out_size * 4 + B * T * 4)

    predict, attn = pl.pallas_call(
        attn_decoder_kernel,
        out_shape=(
            jax.ShapeDtypeStruct((B, out_size), jnp.float32),
            jax.ShapeDtypeStruct((B, T), jnp.float32),
        ),
        grid_spec=pltpu.PrefetchScalarGridSpec(
            num_scalar_prefetch=0,
            grid=grid,
            in_specs=[
                pl.BlockSpec((bB, T, H), lambda b: (b, 0, 0)),      # hidden: streamed over B
                pl.BlockSpec((bB, T), lambda b: (b, 0)),            # masks : streamed over B
                pl.BlockSpec((H, H2), lambda b: (0, 0)),            # w1    : resident
                pl.BlockSpec((1, H2), lambda b: (0, 0)),            # b1    : resident
                pl.BlockSpec((1, H2), lambda b: (0, 0)),            # w2 row: resident
                pl.BlockSpec((H, out_size), lambda b: (0, 0)),      # wo    : resident
                pl.BlockSpec((1, out_size), lambda b: (0, 0)),      # bo    : resident
            ],
            out_specs=(
                pl.BlockSpec((bB, out_size), lambda b: (b, 0)),
                pl.BlockSpec((bB, T), lambda b: (b, 0)),
            ),
        ),
        compiler_params=pltpu.CompilerParams(
            dimension_semantics=("parallel",),       # batch axis -> megacore / v7x 2 TCs
            vmem_limit_bytes=48 * 1024 * 1024,
        ),
        cost_estimate=pl.CostEstimate(
            flops=flops, transcendentals=transcendentals, bytes_accessed=bytes_accessed,
        ),
    )(hidden_in, masks, w1_in, params["b1"], w2_row, params["wo"], params["bo"])
    return predict, attn


def reference(hidden, masks, params):
    B, T, H = hidden.shape
    a1 = jnp.tanh(hidden.reshape(B * T, H) @ params["w1"] + params["b1"])
    scores = (a1 @ params["w2"]).reshape(B, T)
    scores = jnp.where(masks > 0.5, -1e30, scores)
    attn = jax.nn.softmax(scores, axis=-1)
    context = jnp.sum(attn[..., None] * hidden, axis=1)
    predict = context @ params["wo"] + params["bo"]
    return predict, attn


if __name__ == "__main__":
    # Small shapes consistent with the module: batch=16, seq=8, hidden=32, output_size=1.
    B, T, H = 16, 8, 32
    H2 = H // 2          # TanhAttention projection size
    OUT = 1              # output_size

    key = jax.random.PRNGKey(0)
    k_hid, k_w1, k_b1, k_w2, k_wo, k_bo = jax.random.split(key, 6)

    hidden = jax.random.normal(k_hid, (B, T, H), dtype=jnp.float32)
    # masks: 1.0 = padded; pad the tails of a few batch rows.
    masks = jnp.zeros((B, T), dtype=jnp.float32)
    masks = masks.at[1, 6:].set(1.0).at[3, 4:].set(1.0).at[9, 2:].set(1.0)

    params = {
        "w1": jax.random.normal(k_w1, (H, H2), dtype=jnp.float32) * 0.1,   # attention.attn1.weight^T
        "b1": jax.random.normal(k_b1, (1, H2), dtype=jnp.float32) * 0.1,   # attention.attn1.bias
        "w2": jax.random.normal(k_w2, (H2, OUT), dtype=jnp.float32) * 0.1, # attention.attn2.weight^T (no bias)
        "wo": jax.random.normal(k_wo, (H, OUT), dtype=jnp.float32) * 0.1,  # linear_1.weight^T
        "bo": jax.random.normal(k_bo, (1, OUT), dtype=jnp.float32) * 0.1,  # linear_1.bias
    }

    # f32 path: max_block_b=8 -> batch blocks of 8 rows, grid=(2,), exercises real tiling.
    predict, attn = attn_decoder(hidden, masks, params, max_block_b=8)
    jax.block_until_ready((predict, attn))

    ref_predict, ref_attn = reference(hidden, masks, params)
    # Tolerances account for the approximate EUP reciprocal in the softmax normalization.
    assert jnp.allclose(attn, ref_attn, atol=5e-3, rtol=5e-3), "attn mismatch"
    assert jnp.allclose(predict, ref_predict, atol=5e-3, rtol=5e-3), "predict mismatch"
    assert float(jnp.abs(jnp.sum(attn, axis=-1) - 1.0).max()) < 5e-3
    # masked positions must carry (numerically) zero attention
    assert float(attn[1, 6:].sum() + attn[3, 4:].sum() + attn[9, 2:].sum()) < 1e-6

    # bf16 streaming path (halves HBM bytes of the dominant hidden stream; f32 accumulate).
    predict_bf, attn_bf = attn_decoder(hidden, masks, params, max_block_b=8, use_bf16=True)
    jax.block_until_ready((predict_bf, attn_bf))
    assert jnp.allclose(attn_bf, ref_attn, atol=5e-2, rtol=5e-2), "bf16 attn mismatch"
    assert jnp.allclose(predict_bf, ref_predict, atol=5e-2, rtol=5e-2), "bf16 predict mismatch"

    print("KERNEL_OK")
</pallas_src>

<mosaic_0001>
module attributes {stable_mosaic.version = 11 : i64} {
  func.func @attn_decoder_kernel(%arg0: i32, %arg1: memref<8x8x32xf32, #tpu.memory_space<vmem>>, %arg2: memref<8x8xf32, #tpu.memory_space<vmem>>, %arg3: memref<32x16xf32, #tpu.memory_space<vmem>>, %arg4: memref<1x16xf32, #tpu.memory_space<vmem>>, %arg5: memref<1x16xf32, #tpu.memory_space<vmem>>, %arg6: memref<32x1xf32, #tpu.memory_space<vmem>>, %arg7: memref<1x1xf32, #tpu.memory_space<vmem>>, %arg8: memref<8x1xf32, #tpu.memory_space<vmem>>, %arg9: memref<8x8xf32, #tpu.memory_space<vmem>>) attributes {dimension_semantics = [#tpu.dimension_semantics<parallel>], iteration_bounds = array<i64: 2>, scalar_prefetch = 0 : i64, scratch_operands = 0 : i64, tpu.core_type = #tpu.core_type<tc>, window_params = [{transform_indices = @transform_0, window_bounds = array<i64: 8, 8, 32>}, {transform_indices = @transform_1, window_bounds = array<i64: 8, 8>}, {pipeline_mode = #tpu.pipeline_mode<synchronous>, transform_indices = @transform_2, window_bounds = array<i64: 32, 16>}, {pipeline_mode = #tpu.pipeline_mode<synchronous>, transform_indices = @transform_3, window_bounds = array<i64: 1, 16>}, {pipeline_mode = #tpu.pipeline_mode<synchronous>, transform_indices = @transform_4, window_bounds = array<i64: 1, 16>}, {pipeline_mode = #tpu.pipeline_mode<synchronous>, transform_indices = @transform_5, window_bounds = array<i64: 32, 1>}, {pipeline_mode = #tpu.pipeline_mode<synchronous>, transform_indices = @transform_6, window_bounds = array<i64: 1, 1>}, {transform_indices = @transform_7, window_bounds = array<i64: 8, 1>}, {transform_indices = @transform_8, window_bounds = array<i64: 8, 8>}]} {
    %c0 = arith.constant 0 : index
    %c0_0 = arith.constant 0 : index
    %c0_1 = arith.constant 0 : index
    %0 = vector.load %arg1[%c0, %c0_0, %c0_1] : memref<8x8x32xf32, #tpu.memory_space<vmem>>, vector<8x8x32xf32>
    %1 = vector.shape_cast %0 : vector<8x8x32xf32> to vector<64x32xf32>
    %c0_2 = arith.constant 0 : index
    %c0_3 = arith.constant 0 : index
    %2 = vector.load %arg3[%c0_2, %c0_3] : memref<32x16xf32, #tpu.memory_space<vmem>>, vector<32x16xf32>
    %cst = arith.constant dense<0.000000e+00> : vector<64x16xf32>
    %3 = tpu.matmul %1, %2, %cst {dimension_numbers = #tpu.dot_dimension_numbers<[1], [0], [0], [1], [0, 0, 1, 1], [], []>} : vector<64x32xf32>, vector<32x16xf32>, vector<64x16xf32> -> vector<64x16xf32>
    %c0_4 = arith.constant 0 : index
    %c0_5 = arith.constant 0 : index
    %4 = vector.load %arg4[%c0_4, %c0_5] : memref<1x16xf32, #tpu.memory_space<vmem>>, vector<1x16xf32>
    %5 = vector.broadcast %4 : vector<1x16xf32> to vector<64x16xf32>
    %6 = arith.addf %3, %5 : vector<64x16xf32>
    %7 = math.tanh %6 : vector<64x16xf32>
    %8 = vector.shape_cast %7 : vector<64x16xf32> to vector<8x8x16xf32>
    %c0_6 = arith.constant 0 : index
    %c0_7 = arith.constant 0 : index
    %9 = vector.load %arg5[%c0_6, %c0_7] : memref<1x16xf32, #tpu.memory_space<vmem>>, vector<1x16xf32>
    %10 = vector.shape_cast %9 : vector<1x16xf32> to vector<1x1x16xf32>
    %11 = vector.broadcast %10 : vector<1x1x16xf32> to vector<8x8x16xf32>
    %12 = arith.mulf %8, %11 : vector<8x8x16xf32>
    %cst_8 = arith.constant dense<0.000000e+00> : vector<8x8xf32>
    %13 = vector.multi_reduction <add>, %12, %cst_8 [2] : vector<8x8x16xf32> to vector<8x8xf32>
    %c0_9 = arith.constant 0 : index
    %c0_10 = arith.constant 0 : index
    %14 = vector.load %arg2[%c0_9, %c0_10] : memref<8x8xf32, #tpu.memory_space<vmem>>, vector<8x8xf32>
    %cst_11 = arith.constant 5.000000e-01 : f32
    %15 = vector.broadcast %cst_11 : f32 to vector<8x8xf32>
    %16 = arith.cmpf ogt, %14, %15 : vector<8x8xf32>
    %cst_12 = arith.constant -1.000000e+30 : f32
    %17 = vector.broadcast %cst_12 : f32 to vector<8x8xf32>
    %18 = arith.select %16, %17, %13 : vector<8x8xi1>, vector<8x8xf32>
    %cst_13 = arith.constant dense<0xFF800000> : vector<8xf32>
    %19 = vector.multi_reduction <maximumf>, %18, %cst_13 [1] : vector<8x8xf32> to vector<8xf32>
    %20 = vector.shape_cast %19 : vector<8xf32> to vector<8x1xf32>
    %21 = vector.broadcast %20 : vector<8x1xf32> to vector<8x8xf32>
    %22 = arith.subf %18, %21 : vector<8x8xf32>
    %23 = math.exp %22 : vector<8x8xf32>
    %cst_14 = arith.constant dense<0.000000e+00> : vector<8xf32>
    %24 = vector.multi_reduction <add>, %23, %cst_14 [1] : vector<8x8xf32> to vector<8xf32>
    %25 = vector.shape_cast %24 : vector<8xf32> to vector<8x1xf32>
    %26 = tpu.reciprocal %25 {approx = true} : vector<8x1xf32> -> vector<8x1xf32>
    %27 = vector.broadcast %26 : vector<8x1xf32> to vector<8x8xf32>
    %28 = arith.mulf %23, %27 : vector<8x8xf32>
    %c0_15 = arith.constant 0 : index
    %c0_16 = arith.constant 0 : index
    %29 = vector.load %arg9[%c0_15, %c0_16] : memref<8x8xf32, #tpu.memory_space<vmem>>, vector<8x8xf32>
    tpu.vector_store %arg9[%c0_15, %c0_16], %28 {strides = array<i32>} : memref<8x8xf32, #tpu.memory_space<vmem>>, vector<8x8xf32>,
    %30 = vector.shape_cast %28 : vector<8x8xf32> to vector<8x1x8xf32>
    "tpu.trace_start"() <{level = 10 : i32, message = "bqt,bth->bqh"}> : () -> ()
    %cst_17 = arith.constant dense<0.000000e+00> : vector<8x1x32xf32>
    %31 = tpu.matmul %30, %0, %cst_17 {dimension_numbers = #tpu.dot_dimension_numbers<[2], [1], [1], [2], [0, 0, 0, 1, 1, 2], [0], [0]>} : vector<8x1x8xf32>, vector<8x8x32xf32>, vector<8x1x32xf32> -> vector<8x1x32xf32>
    "tpu.trace_stop"() : () -> ()
    %32 = vector.shape_cast %31 : vector<8x1x32xf32> to vector<8x32xf32>
    %c0_18 = arith.constant 0 : index
    %c0_19 = arith.constant 0 : index
    %33 = vector.load %arg6[%c0_18, %c0_19] : memref<32x1xf32, #tpu.memory_space<vmem>>, vector<32x1xf32>
    %cst_20 = arith.constant dense<0.000000e+00> : vector<8x1xf32>
    %34 = tpu.matmul %32, %33, %cst_20 {dimension_numbers = #tpu.dot_dimension_numbers<[1], [0], [0], [1], [0, 0, 1, 1], [], []>} : vector<8x32xf32>, vector<32x1xf32>, vector<8x1xf32> -> vector<8x1xf32>
    %c0_21 = arith.constant 0 : index
    %c0_22 = arith.constant 0 : index
    %35 = vector.load %arg7[%c0_21, %c0_22] : memref<1x1xf32, #tpu.memory_space<vmem>>, vector<1x1xf32>
    %36 = vector.broadcast %35 : vector<1x1xf32> to vector<8x1xf32>
    %37 = arith.addf %34, %36 : vector<8x1xf32>
    %c0_23 = arith.constant 0 : index
    %c0_24 = arith.constant 0 : index
    %38 = vector.load %arg8[%c0_23, %c0_24] : memref<8x1xf32, #tpu.memory_space<vmem>>, vector<8x1xf32>
    tpu.vector_store %arg8[%c0_23, %c0_24], %37 {strides = array<i32>} : memref<8x1xf32, #tpu.memory_space<vmem>>, vector<8x1xf32>,
    return
  }
  func.func @transform_0(%arg0: i32) -> (i32, i32, i32) {
    %c0_i32 = arith.constant 0 : i32
    %c0_i32_0 = arith.constant 0 : i32
    %c0_i32_1 = arith.constant 0 : i32
    return %arg0, %c0_i32, %c0_i32_0 : i32, i32, i32
  }
  func.func @transform_1(%arg0: i32) -> (i32, i32) {
    %c0_i32 = arith.constant 0 : i32
    %c0_i32_0 = arith.constant 0 : i32
    return %arg0, %c0_i32 : i32, i32
  }
  func.func @transform_2(%arg0: i32) -> (i32, i32) {
    %c0_i32 = arith.constant 0 : i32
    %c0_i32_0 = arith.constant 0 : i32
    %c0_i32_1 = arith.constant 0 : i32
    return %c0_i32, %c0_i32_0 : i32, i32
  }
  func.func @transform_3(%arg0: i32) -> (i32, i32) {
    %c0_i32 = arith.constant 0 : i32
    %c0_i32_0 = arith.constant 0 : i32
    %c0_i32_1 = arith.constant 0 : i32
    return %c0_i32, %c0_i32_0 : i32, i32
  }
  func.func @transform_4(%arg0: i32) -> (i32, i32) {
    %c0_i32 = arith.constant 0 : i32
    %c0_i32_0 = arith.constant 0 : i32
    %c0_i32_1 = arith.constant 0 : i32
    return %c0_i32, %c0_i32_0 : i32, i32
  }
  func.func @transform_5(%arg0: i32) -> (i32, i32) {
    %c0_i32 = arith.constant 0 : i32
    %c0_i32_0 = arith.constant 0 : i32
    %c0_i32_1 = arith.constant 0 : i32
    return %c0_i32, %c0_i32_0 : i32, i32
  }
  func.func @transform_6(%arg0: i32) -> (i32, i32) {
    %c0_i32 = arith.constant 0 : i32
    %c0_i32_0 = arith.constant 0 : i32
    %c0_i32_1 = arith.constant 0 : i32
    return %c0_i32, %c0_i32_0 : i32, i32
  }
  func.func @transform_7(%arg0: i32) -> (i32, i32) {
    %c0_i32 = arith.constant 0 : i32
    %c0_i32_0 = arith.constant 0 : i32
    return %arg0, %c0_i32 : i32, i32
  }
  func.func @transform_8(%arg0: i32) -> (i32, i32) {
    %c0_i32 = arith.constant 0 : i32
    %c0_i32_0 = arith.constant 0 : i32
    return %arg0, %c0_i32 : i32, i32
  }
}

</mosaic_0001>

<bundles_post_ra>
// kernel: tpu_custom_call.1
= control target key start
LH: loop header
LB: loop body
LE: loop exit
PB: predicated region body
PF: predicated region fallthrough
CT: control target
= control target key end

     0   :  { %s2032_s0 = inlined_call_operand.hbm [shape: f32[16,8,32], index: 0, kind: input, shape index: {}]   ;;  %s2033_s1 = inlined_call_operand.vmem [shape: f32[16,8], index: 1, kind: input, shape index: {}]   ;;  %s2034_s2 = inlined_call_operand.vmem [shape: f32[32,16], index: 2, kind: input, shape index: {}]   ;;  %s2035_s3 = inlined_call_operand.vmem [shape: f32[1,16], index: 3, kind: input, shape index: {}]   ;;  %s2036_s4 = inlined_call_operand.vmem [shape: f32[1,16], index: 4, kind: input, shape index: {}]   ;;  %s2037_s5 = inlined_call_operand.vmem [shape: f32[32,1], index: 5, kind: input, shape index: {}]   ;;  %s2038_s6 = inlined_call_operand.<no memory space> [shape: f32[1,1], index: 6, kind: input, shape index: {}]   ;;  %s2039_s7 = inlined_call_operand.vmem [shape: f32[16,1], index: 7, kind: output, shape index: {0}]   ;;  %s2040_s8 = inlined_call_operand.vmem [shape: f32[16,8], index: 8, kind: output, shape index: {1}]  }
   0x1   :  { %v14_v0 = vstv %s2038_s6 }
   0x2   :  { %15 = vst [vmem:[#allocation2] sm:$0x1] %v14_v0 }
   0x3   :  { %16 = vsyncpa [#allocation4], 0 }
   0x4   :  { %18 = vsyncpa [#allocation4 + $0x1], 0  ;;  %s1786_s29 = smov 0   ;;  %s1788_s30 = smov 0  }
   0x5   :  { %s1790_s9 = smov 0   ;;  %s1792_s10 = smov 0  }
   0x6 LB: > { %s1805_s6 = sadd.s32 4294967295, %s1730_s10   ;;  %s1808_s11 = sadd.s32 1, %s1730_s10   ;;  %s1730_s10 = sphi %s1792_s10, %s2049_s10   ;;  %s1726_s9 = sphi %s1790_s9, %s2048_s9   ;;  %s1722_s30 = sphi %s1788_s30, %s2047_s30   ;;  %s1718_s29 = sphi %s1786_s29, %s2046_s29  }
   0x7   : > { %s28_s12 = ssub.s32 %s1730_s10, %s1808_s11  ;;  %s31_s13 = sadd.s32 1, %s1726_s9 }
   0x8   : > { %p29_p0 = scmp.eq.s32.totalorder %s28_s12, 0  ;;  %p38_p1 = scmp.ne.s32.totalorder %s1726_s9, %s1722_s30 }
   0x9   : > { %p39_p2 = scmp.eq.s32.totalorder %s1730_s10, 0  ;;  %p44_p3 = scmp.ne.s32.totalorder %s1722_s30, %s1718_s29 }
   0xa   : > { %s1818_s14 = scalar_select %p29_p0, %s1726_s9, %s31_s13  }
   0xb   : > { %p40_p4 = por %p39_p2, %p38_p1  ;;  %p45_p5 = scmp.eq.s32.totalorder %s1805_s6, 0 }
   0xc   : > { %p1610_p6 = scmp.lt.s32.totalorder %s1730_s10, 2  ;;  %s266_s16 = sand.u32 1, %s1726_s9  }
   0xd   : > { %p1822_p7 = por %p45_p5, %p44_p3  ;;  %s1469_s17 = sshll.u32 %s266_s16, 6 }
   0xe   : > { %s1499_s18 = sshll.u32 %s1730_s10, 10  ;;  %s270_s22 = scalar_lea.vmem [#allocation3], %s1469_s17 }
   0xf   : > { %s2042_s15 = scalar_select %p1822_p7, 1, 0 }
  0x10   : > { %s1831_s21 = scalar_lea.hbm %s2032_s0, %s1499_s18  ;;  %s277_s23 = sshll.u32 %s270_s22, 4  ;;  %s1833_s23 = int_to_ptr.vmem [resolvable:$true] %s277_s23 }
  0x11   : > { %p1835_p8 = pnand %p1610_p6, %p40_p4  ;;  %s1840_s25 = scalar_lea.sflag [#allocation4], %s266_s16 }
  0x12   : > { %s1668_s26 = scalar_lea.hbm %s1831_s21, 1024  ;;  %s1673_s29 = scalar_lea.hbm %s2032_s0, 2048 }
  0x13   : > { %p1669_p10 = scmp.ne.s32.totalorder %s1831_s21, %s1668_s26  ;;  %p1670_p11 = pneg %p1835_p8 }
  0x14   : > { %p1674_p0 = scmp.lt.s32.totalorder %s1831_s21, %s2032_s0  ;;  %p1675_p1 = scmp.lt.s32.totalorder %s1673_s29, %s1668_s26 }
  0x15   : > { %p1671_p12 = pnand %p1670_p11, %p1669_p10 }
  0x16   : > { %p1676_p2 = por %p1675_p1, %p1674_p0 }
  0x17   : > { %p1672_p13 = pneg %p1671_p12 }
  0x19   : > { %p1677_p3 = pnand %p1676_p2, %p1672_p13 }
  0x1b   : > { %1680 = shalt.err (!%p1677_p3)
}
  0x1c   : > { %s1681_s16 = scalar_lea.vmem %s1833_s23, 1024  ;;  %s1732_s17 = smov [#allocation3]  }
  0x1d   : > { %p1682_p4 = scmp.ne.s32.totalorder %s1833_s23, %s1681_s16  ;;  %s1686_s18 = sshll.u32 %s1732_s17, 4  ;;  %s1687_s18 = int_to_ptr.vmem [resolvable:$false] %s1686_s18 }
  0x1e   : > { %s1688_s19 = scalar_lea.vmem %s1687_s18, 2048  ;;  %p1689_p10 = scmp.lt.s32.totalorder %s1833_s23, %s1687_s18 }
  0x1f   : > { %p1684_p5 = pnand %p1682_p4, %p1670_p11  ;;  %p1690_p12 = scmp.lt.s32.totalorder %s1688_s19, %s1681_s16 }
  0x21   : > { %p1685_p6 = pneg %p1684_p5  ;;  %p1691_p9 = por %p1690_p12, %p1689_p10 }
  0x23   : > { %p1692_p7 = pnand %p1691_p9, %p1685_p6 }
  0x25   : > { %1695 = shalt.err (!%p1692_p7)
}
  0x26   : > { %s1733_s20 = smov 128   ;;  %s1734_s22 = smov 8  }
  0x27   : > { %1609 = dma.hbm_to_vmem [thread:$0]  (!%p1835_p8), %s1831_s21, 1024, %s1833_s23, %s1840_s25, %s1733_s20, %s1733_s20, %s1734_s22  }
  0x28   : > { %p292_p11 = scmp.lt.s32.totalorder %s1730_s10, 3  ;;  %p2044_p13 = scmp.ge.s32.totalorder %s1730_s10, 1 }
  0x2a   : > { %p293_p0 = pnand %p2044_p13, %p292_p11 }
  0x2b   : > { %s298_s26 = sand.u32 (!%p293_p0), 1, %s1722_s30   ;;  %p2045_p7 = scmp.ne.s32.totalorder (!%p293_p0), %s2042_s15, 0 }
  0x2c   : > { %296 = sbr.rel (%p293_p0) target bundleno = 1165 (0x48d), region = 48  ;;  %s1473_s27 = sshll.u32 (!%p293_p0), %s298_s26, 6 }
  0x2d   : > { %s299_s28 = scalar_lea.sflag (!%p293_p0), [#allocation4], %s298_s26  ;;  %s302_s29 = scalar_lea.vmem (!%p293_p0), [#allocation3], %s1473_s27 }
  0x31   : > { %1713 = dma.done.wait (%p2045_p7), %s299_s28, 1024  }
  0x32   : > { %1715 = vsyncadd (%p2045_p7), %s299_s28, 4294966272  ;;  %vm374_vm0 = vcmask 261120   ;;  %v366_v1 = vld [vmem:[%s2034_s2 + $0x18] sm:$0xff]  ;;  %v365_v2 = vld [vmem:[%s2034_s2 + $0x10] sm:$0xff]  ;;  %vm527_vm1 = vcmask 130048   ;;  %v562_v55 = vlaneseq  ;;  %p343_p8 = scmp.lt.s32.totalorder %s1805_s6, 1 }
  0x33   : > { %1533 = vmatprep.subr.mxu0 %v366_v1  ;;  %v1875_v3 = vld [vmem:[%s302_s29] sm:$0xff]  ;;  %v1885_v6 = vld [vmem:[%s302_s29 + $0x8] sm:$0xff]  ;;  %v1887_v7 = vld [vmem:[%s302_s29 + $0x10] sm:$0xff]  ;;  %vm596_vm2 = vcmask 1041409   ;;  %vm598_vm3 = vcmask 1042434   ;;  %vm600_vm4 = vcmask 1043459  }
  0x34   : > { %1534 = vmatpush3.msra.mxu0 %v366_v1  ;;  %v364_v4 = vld [vmem:[%s2034_s2 + $0x8] sm:$0xff]  ;;  %1541 = vmatprep.mubr.msk.f32.mxu0 %vm374_vm0, %v1875_v3  ;;  %v363_v5 = vld [vmem:[%s2034_s2] sm:$0xff]  ;;  %v1903_v11 = vld [vmem:[%s302_s29 + $0x30] sm:$0xff]  ;;  %v563_v56 = vand.u32 127, %v562_v55  ;;  %v565_v57 = vshrl.u32 %v562_v55, 7  ;;  %s2051_s6 = smov (!%p343_p8, %s1805_s6), 1 }
  0x35   : > { %1535 = vmatprep.subr.mxu0 %v365_v2  ;;  %v1893_v8 = vld [vmem:[%s302_s29 + $0x18] sm:$0xff]  ;;  %v1895_v9 = vld [vmem:[%s302_s29 + $0x20] sm:$0xff]  ;;  %v1901_v10 = vld [vmem:[%s302_s29 + $0x28] sm:$0xff]  ;;  %s1929_s20 = sshll.u32 %s2051_s6, 3  ;;  %vm602_vm5 = vcmask 1044484   ;;  %vm604_vm6 = vcmask 1045509  }
  0x36   : > { %1536 = vmatpush3.msra.mxu0 %v365_v2  ;;  %v1909_v12 = vld [vmem:[%s302_s29 + $0x38] sm:$0xff]  ;;  %v566_v59 = vsub.s32 %v563_v56, %v565_v57  ;;  %s346_s27 = scalar_lea.vmem %s2033_s1, %s1929_s20  ;;  %vm606_vm7 = vcmask 1046534   ;;  %vm608_vm8 = vcmask 1047559   ;;  %vm612_vm10 = vcmask 64512   ;;  %s354_s29 = scalar_lea.vmem %s2040_s8, %s1929_s20 }
  0x37   : > { %1537 = vmatprep.subr.mxu0 %v364_v4  ;;  %v1477_v13 = vld [vmem:[%s2035_s3] ss:$0 sm:$0xff]  ;;  %vm1736_vm11 = vmmov 0   ;;  %s350_s18 = scalar_lea.vmem %s2039_s7, %s1929_s20  ;;  %vm1356_vm12 = vcmask 7168  }
  0x38   : > { %1538 = vmatpush3.msra.mxu0 %v364_v4  ;;  %v1486_v29 = vld [vmem:[%s2036_s4] ss:$0 sm:$0xff] }
  0x39   : > { %1539 = vmatprep.subr.mxu0 %v363_v5 }
  0x3a   : > { %1540 = vmatpush3.msra.mxu0 %v363_v5 }
  0x3b   : > { %1542 = vmatmul.mubr.msk.f32.vlgmr.msra.gmra.mxu0 %vm374_vm0, %v1885_v6 }
  0x3c   : > { %1544 = vmatprep.mubr.msk.f32.mxu0 %vm374_vm0, %v1887_v7 }
  0x3f   : > { %1545 = vmatmul.mubr.msk.f32.gmra.mxu0 %vm374_vm0, %v1893_v8 }
  0x40   : > { %1547 = vmatprep.mubr.msk.f32.mxu0 %vm374_vm0, %v1895_v9 }
  0x43   : > { %1548 = vmatmul.mubr.msk.f32.gmra.mxu0 %vm374_vm0, %v1901_v10 }
  0x44   : > { %1550 = vmatprep.mubr.msk.f32.mxu0 %vm374_vm0, %v1903_v11 }
  0x47   : > { %1551 = vmatmul.mubr.msk.f32.gmra.mxu0 %vm374_vm0, %v1909_v12 }
  0xfb   : > { %v1543_v14 = vpop.f32.mrf.mxu0 }
  0xfc   : > { %v471_v15 = vadd.f32 %v1543_v14, %v1477_v13 }
  0xfd   : > { %v465_v16 = vpop.f32.mrf.mxu0 }
  0xfe   : > { %1648 = vtanh.f32 %v471_v15  ;;  %v466_v17 = vadd.f32 %v1477_v13, %v465_v16 }
  0xff   : > { %v1546_v18 = vpop.f32.mrf.mxu0 }
 0x100   : > { %1650 = vtanh.f32 %v466_v17  ;;  %v481_v19 = vadd.f32 %v1546_v18, %v1477_v13 }
 0x101   : > { %v475_v20 = vpop.f32.mrf.mxu0 }
 0x102   : > { %1652 = vtanh.f32 %v481_v19  ;;  %v476_v21 = vadd.f32 %v1477_v13, %v475_v20  ;;  %v552_v20 = vld [vmem:[%s346_s27] sm:$0xff] }
 0x103   : > { %v1549_v22 = vpop.f32.mrf.mxu0  ;;  %vm553_vm9 = vcmp.gt.f32.partialorder %v552_v20, 0.5 }
 0x104   : > { %1654 = vtanh.f32 %v476_v21  ;;  %v491_v23 = vadd.f32 %v1549_v22, %v1477_v13 }
 0x105   : > { %v485_v24 = vpop.f32.mrf.mxu0 }
 0x106   : > { %1656 = vtanh.f32 %v491_v23  ;;  %v486_v25 = vadd.f32 %v1477_v13, %v485_v24 }
 0x107   : > { %v1552_v26 = vpop.f32.mrf.mxu0 }
 0x108   : > { %1658 = vtanh.f32 %v486_v25  ;;  %v501_v27 = vadd.f32 %v1552_v26, %v1477_v13 }
 0x109   : > { %v495_v28 = vpop.f32.mrf.mxu0 }
 0x10a   : > { %1660 = vtanh.f32 %v501_v27  ;;  %v496_v30 = vadd.f32 %v1477_v13, %v495_v28 }
 0x10b   : > { %v1649_v31 = vpop.eup %1648 }
 0x10c   : > { %1662 = vtanh.f32 %v496_v30  ;;  %v520_v32 = vmul.f32 %v1649_v31, %v1486_v29 }
 0x10d   : > { %v1651_v33 = vpop.eup %1650 }
 0x10e   : > { %v531_v34 = vsel %vm527_vm1, %v520_v32, 0.0  ;;  %v519_v35 = vmul.f32 %v1651_v33, %v1486_v29 }
 0x10f   : > { %v1653_v36 = vpop.eup %1652  ;;  %532 = vadd.xlane.f32.xlu0 %v531_v34  ;;  %v1735_v34 = vmov 0.0  }
 0x110   : > { %v522_v37 = vmul.f32 %v1653_v36, %v1486_v29  ;;  %v528_v40 = vsel %vm527_vm1, %v519_v35, 0.0  ;;  %1553 = vmatprep.subr.mxu1 %v1735_v34  ;;  %1555 = vmatprep.mubr.msk.f32.mxu1 %vm1736_vm11, %v1735_v34  ;;  %v1737_v36 = vmov 1966171168  }
 0x111   : > { %v1655_v38 = vpop.eup %1654  ;;  %1554 = vmatpush3.msra.mxu1 %v1875_v3  ;;  %1593 = vmatprep.subr.mxu0 %v1735_v34 }
 0x112   : > { %v537_v39 = vsel %vm527_vm1, %v522_v37, 0.0  ;;  %v521_v41 = vmul.f32 %v1655_v38, %v1486_v29  ;;  %1558 = vmatprep.subr.mxu1 %v1735_v34  ;;  %1601 = vmatprep.mubr.msk.f32.mxu0 %vm1736_vm11, %v1735_v34  ;;  %v628_v37 = vunpack.c.l.s4 %v1737_v36 }
 0x113   : > { %v1657_v42 = vpop.eup %1656  ;;  %538 = vadd.xlane.f32.xlu1 %v537_v39  ;;  %529 = vadd.xlane.f32.xlu0 %v528_v40 }
 0x114   : > { %v534_v44 = vsel %vm527_vm1, %v521_v41, 0.0  ;;  %v524_v46 = vmul.f32 %v1657_v42, %v1486_v29  ;;  %v629_v38 = vunpack.c.0.s8 %v628_v37 }
 0x115   : > { %v1659_v43 = vpop.eup %1658 }
 0x116   : > { %v523_v45 = vmul.f32 %v1659_v43, %v1486_v29  ;;  %v543_v50 = vsel %vm527_vm1, %v524_v46, 0.0  ;;  %v632_v39 = vsub.s32 %v629_v38, %v565_v57 }
 0x117   : > { %v1661_v47 = vpop.eup %1660  ;;  %535 = vadd.xlane.f32.xlu1 %v534_v44 }
 0x118   : > { %v540_v48 = vsel %vm527_vm1, %v523_v45, 0.0  ;;  %v526_v52 = vmul.f32 %v1661_v47, %v1486_v29 }
 0x119   : > { %v1663_v49 = vpop.eup %1662  ;;  %541 = vadd.xlane.f32.xlu0 %v540_v48 }
 0x11a   : > { %v525_v51 = vmul.f32 %v1663_v49, %v1486_v29  ;;  %v549_v54 = vsel %vm527_vm1, %v526_v52, 0.0  ;;  %v1253_v49 = vld [vmem:[%s2037_s5 + $0x10] sm:$0xff] }
 0x11b   : > { %544 = vadd.xlane.f32.xlu1 %v543_v50  ;;  %v1251_v50 = vld [vmem:[%s2037_s5] sm:$0xff] }
 0x11c   : > { %v546_v53 = vsel %vm527_vm1, %v525_v51, 0.0 }
 0x11d   : > { %547 = vadd.xlane.f32.xlu0 %v546_v53 }
 0x11f   : > { %550 = vadd.xlane.f32.xlu1 %v549_v54 }
 0x198   : > { %v533_v58 = vpop.xlane.xlu0 %532 }
 0x199   : > { %v571_v63 = vrot.slane %v533_v58, %v566_v59 }
 0x19c   : > { %v539_v60 = vpop.xlane.xlu1 %538  ;;  %v530_v61 = vpop.xlane.xlu0 %529 }
 0x19d   : > { %v567_v62 = vrot.slane %v530_v61, %v566_v59  ;;  %v579_v2 = vrot.slane %v539_v60, %v566_v59 }
 0x19f   : > { %v597_v4 = vsel %vm596_vm2, %v571_v63, %v567_v62 }
 0x1a0   : > { %v536_v0 = vpop.xlane.xlu1 %535 }
 0x1a1   : > { %v575_v1 = vrot.slane %v536_v0, %v566_v59 }
 0x1a2   : > { %v542_v5 = vpop.xlane.xlu0 %541 }
 0x1a3   : > { %v599_v13 = vsel %vm598_vm3, %v575_v1, %v597_v4  ;;  %v583_v14 = vrot.slane %v542_v5, %v566_v59 }
 0x1a4   : > { %v601_v15 = vsel %vm600_vm4, %v579_v2, %v599_v13  ;;  %v545_v16 = vpop.xlane.xlu1 %544 }
 0x1a5   : > { %v603_v17 = vsel %vm602_vm5, %v583_v14, %v601_v15  ;;  %v587_v18 = vrot.slane %v545_v16, %v566_v59 }
 0x1a6   : > { %v548_v19 = vpop.xlane.xlu0 %547 }
 0x1a7   : > { %v605_v21 = vsel %vm604_vm6, %v587_v18, %v603_v17  ;;  %v591_v22 = vrot.slane %v548_v19, %v566_v59 }
 0x1a8   : > { %v551_v23 = vpop.xlane.xlu1 %550 }
 0x1a9   : > { %v595_v24 = vrot.slane %v551_v23, %v566_v59  ;;  %v607_v25 = vsel %vm606_vm7, %v591_v22, %v605_v21 }
 0x1ab   : > { %v609_v26 = vsel %vm608_vm8, %v595_v24, %v607_v25  ;;  %v1495_v25 = vld [vmem:[#allocation2] ss:$0 sm:$0xff] }
 0x1ac   : > { %v611_v27 = vsel %vm553_vm9, -1e+30, %v609_v26 }
 0x1ad   : > { %v613_v28 = vsel %vm612_vm10, %v611_v27, -inf }
 0x1ae   : > { %614 = vmax.xlane.f32.xlu0 %v613_v28 }
 0x237   : > { %v615_v29 = vpop.xlane.xlu0 %614 }
 0x238   : > { %v616_v30 = vsub.f32 %v611_v27, %v615_v29 }
 0x23a   : > { %v617_v31 = vmul.f32 1.442695, %v616_v30 }
 0x23c   : > { %1664 = vpow2.f32 %v617_v31 }
 0x249   : > { %v1665_v32 = vpop.eup %1664 }
 0x24a   : > { %v619_v33 = vsel %vm612_vm10, %v1665_v32, 0.0 }
 0x24b   : > { %620 = vadd.xlane.f32.xlu1 %v619_v33 }
 0x2d4   : > { %v621_v35 = vpop.xlane.xlu1 %620 }
 0x2d5   : > { %1666 = vrcp.f32 %v621_v35 }
 0x2e2   : > { %v1667_v40 = vpop.eup %1666 }
 0x2e3   : > { %v623_v41 = vmul.f32 %v1667_v40, %v1665_v32 }
 0x2e5   : > { %624 = vst.msk [vmem:[%s354_s29] sm:$0xff] %vm612_vm10, %v623_v41  ;;  %v633_v3 = vrot.slane %v623_v41, %v632_v39  ;;  %v626_v46 = vcombine.high %v623_v41, %v623_v41 }
 0x2e7   : > { %v641_v42 = vcombine.high %v633_v3, %v633_v3  ;;  %v649_v43 = vrot.slane %v633_v3, %v632_v39  ;;  %v640_v47 = vrot.slane %v626_v46, %v632_v39 }
 0x2e9   : > { %1556 = vmatmul.mubr.msk.f32.vlgmr.msra.gmra.mxu1 %vm612_vm10, %v649_v43  ;;  %v663_v44 = vrot.slane %v641_v42, %v632_v39  ;;  %v671_v45 = vcombine.high %v649_v43, %v649_v43  ;;  %v642_v48 = vcombine.high %v640_v47, %v640_v47 }
 0x2ea   : > { %1559 = vmatpush3.msra.mxu1 %v1885_v6  ;;  %1560 = vmatprep.mubr.msk.f32.mxu1 %vm1736_vm11, %v1735_v34 }
 0x2eb   : > { %1563 = vmatprep.subr.mxu1 %v1735_v34  ;;  %v673_v6 = vcombine.high %v663_v44, %v663_v44 }
 0x2ed   : > { %1561 = vmatmul.mubr.msk.f32.vlgmr.msra.gmra.mxu1 %vm612_vm10, %v663_v44 }
 0x2ee   : > { %1564 = vmatpush3.msra.mxu1 %v1887_v7  ;;  %1565 = vmatprep.mubr.msk.f32.mxu1 %vm1736_vm11, %v1735_v34  ;;  %v656_v7 = vrot.slane %v640_v47, %v632_v39 }
 0x2ef   : > { %1568 = vmatprep.subr.mxu1 %v1735_v34 }
 0x2f1   : > { %1566 = vmatmul.mubr.msk.f32.vlgmr.msra.gmra.mxu1 %vm612_vm10, %v671_v45 }
 0x2f2   : > { %1569 = vmatpush3.msra.mxu1 %v1893_v8  ;;  %1570 = vmatprep.mubr.msk.f32.mxu1 %vm1736_vm11, %v1735_v34  ;;  %v670_v8 = vrot.slane %v642_v48, %v632_v39 }
 0x2f3   : > { %1573 = vmatprep.subr.mxu1 %v1735_v34 }
 0x2f5   : > { %1571 = vmatmul.mubr.msk.f32.vlgmr.msra.gmra.mxu1 %vm612_vm10, %v673_v6 }
 0x2f6   : > { %1574 = vmatpush3.msra.mxu1 %v1895_v9  ;;  %1575 = vmatprep.mubr.msk.f32.mxu1 %vm1736_vm11, %v1735_v34  ;;  %v672_v9 = vcombine.high %v656_v7, %v656_v7 }
 0x2f7   : > { %1578 = vmatprep.subr.mxu1 %v1735_v34 }
 0x2f9   : > { %1576 = vmatmul.mubr.msk.f32.vlgmr.msra.gmra.mxu1 %vm612_vm10, %v656_v7 }
 0x2fa   : > { %1579 = vmatpush3.msra.mxu1 %v1901_v10  ;;  %1580 = vmatprep.mubr.msk.f32.mxu1 %vm1736_vm11, %v1735_v34  ;;  %v674_v10 = vcombine.high %v670_v8, %v670_v8 }
 0x2fb   : > { %1583 = vmatprep.subr.mxu1 %v1735_v34 }
 0x2fd   : > { %1581 = vmatmul.mubr.msk.f32.vlgmr.msra.gmra.mxu1 %vm612_vm10, %v670_v8 }
 0x2fe   : > { %1584 = vmatpush3.msra.mxu1 %v1903_v11  ;;  %1585 = vmatprep.mubr.msk.f32.mxu1 %vm1736_vm11, %v1735_v34  ;;  %v1254_v11 = vld [vmem:[%s2037_s5 + $0x18] sm:$0xff] }
 0x2ff   : > { %1588 = vmatprep.subr.mxu1 %v1735_v34  ;;  %1594 = vmatpush3.msra.mxu0 %v1254_v11 }
 0x300   : > { %1595 = vmatprep.subr.mxu0 %v1735_v34 }
 0x301   : > { %1586 = vmatmul.mubr.msk.f32.vlgmr.msra.gmra.mxu1 %vm612_vm10, %v672_v9  ;;  %1596 = vmatpush3.msra.mxu0 %v1253_v49 }
 0x302   : > { %1589 = vmatpush3.msra.mxu1 %v1909_v12  ;;  %1590 = vmatprep.mubr.msk.f32.mxu1 %vm1736_vm11, %v1735_v34  ;;  %v1252_v12 = vld [vmem:[%s2037_s5 + $0x8] sm:$0xff] }
 0x303   : > { %1597 = vmatprep.subr.mxu0 %v1735_v34 }
 0x304   : > { %1598 = vmatpush3.msra.mxu0 %v1252_v12 }
 0x305   : > { %1591 = vmatmul.mubr.msk.f32.vlgmr.msra.gmra.mxu1 %vm612_vm10, %v674_v10  ;;  %1599 = vmatprep.subr.mxu0 %v1735_v34 }
 0x306   : > { %1600 = vmatpush3.msra.mxu0 %v1251_v50 }
 0x3a9   : > { %v743_v51 = vpop.f32.mrf.mxu1 }
 0x3ab   : > { %v1557_v52 = vpop.f32.mrf.mxu1 }
 0x3ad   : > { %v815_v53 = vpop.f32.mrf.mxu1 }
 0x3ae   : > { %v1270_v62 = vrot.slane %v815_v53, 7 }
 0x3af   : > { %v1562_v54 = vpop.f32.mrf.mxu1 }
 0x3b0   : > { %v1271_v5 = vsel %vm596_vm2, %v1270_v62, %v743_v51 }
 0x3b1   : > { %v887_v55 = vpop.f32.mrf.mxu1 }
 0x3b2   : > { %v1272_v63 = vrot.slane %v887_v55, 6 }
 0x3b3   : > { %v1567_v56 = vpop.f32.mrf.mxu1 }
 0x3b4   : > { %v1273_v14 = vsel %vm598_vm3, %v1272_v63, %v1271_v5 }
 0x3b5   : > { %v959_v57 = vpop.f32.mrf.mxu1 }
 0x3b6   : > { %v1274_v1 = vrot.slane %v959_v57, 5 }
 0x3b7   : > { %v1572_v58 = vpop.f32.mrf.mxu1 }
 0x3b8   : > { %v1275_v17 = vsel %vm600_vm4, %v1274_v1, %v1273_v14 }
 0x3b9   : > { %v1031_v59 = vpop.f32.mrf.mxu1 }
 0x3ba   : > { %v1276_v2 = vrot.slane %v1031_v59, 4 }
 0x3bb   : > { %v1577_v60 = vpop.f32.mrf.mxu1 }
 0x3bc   : > { %v1277_v18 = vsel %vm602_vm5, %v1276_v2, %v1275_v17 }
 0x3bd   : > { %v1103_v61 = vpop.f32.mrf.mxu1 }
 0x3be   : > { %v1278_v13 = vrot.slane %v1103_v61, 3 }
 0x3bf   : > { %v1582_v0 = vpop.f32.mrf.mxu1 }
 0x3c0   : > { %v1279_v20 = vsel %vm604_vm6, %v1278_v13, %v1277_v18 }
 0x3c1   : > { %v1175_v4 = vpop.f32.mrf.mxu1 }
 0x3c2   : > { %v1280_v15 = vrot.slane %v1175_v4, 2 }
 0x3c3   : > { %v1587_v16 = vpop.f32.mrf.mxu1 }
 0x3c4   : > { %v1281_v22 = vsel %vm606_vm7, %v1280_v15, %v1279_v20 }
 0x3c5   : > { %v1247_v19 = vpop.f32.mrf.mxu1 }
 0x3c6   : > { %v1282_v21 = vrot.slane %v1247_v19, 1 }
 0x3c7   : > { %v1592_v23 = vpop.f32.mrf.mxu1 }
 0x3c8   : > { %v1283_v24 = vsel %vm608_vm8, %v1282_v21, %v1281_v22 }
 0x3c9   : > { %1602 = vmatmul.mubr.msk.f32.vlgmr.msra.gmra.mxu0 %vm374_vm0, %v1283_v24 }
 0x489   : > { %v1352_v26 = vpop.f32.mrf.mxu0 }
 0x48a   : > { %v1353_v27 = vadd.f32 %v1495_v25, %v1352_v26 }
 0x48b   : > { %v1603_v28 = vpop.f32.mrf.mxu0 }
 0x48c   : > { %1357 = vst.msk [vmem:[%s350_s18] sm:$0xff] %vm1356_vm12, %v1353_v27 }
 0x48d PF: > { %p21_p9 = scmp.ge.s32.totalorder %s1808_s11, 4   ;;  %s2046_s29 = smov %s1722_s30 }
 0x48e   : > { %s2047_s30 = smov %s1726_s9  ;;  %s2048_s9 = smov %s1818_s14 }
 0x48f   : > { %s2049_s10 = smov %s1808_s11  ;;  %23 = sbr.rel (!%p21_p9) target bundleno = 6 (0x6), region = 103 }
 0x494   :  { %1391 = vsyncpa [#allocation4], 1 }
 0x495   :  { %1393 = vsyncpa [#allocation4 + $0x1], 1 }

</bundles_post_ra>
